<compile_context>
chip_gen: v7x
topology: tpu7x:2x2x1
jax: 0.10.0
libtpu: 0.0.40
codegen_flags: <defaults>
</compile_context>

<pallas_src>
import functools
import numpy as np
import jax
import jax.numpy as jnp
from jax import lax
from jax.experimental import pallas as pl
from jax.experimental.pallas import tpu as pltpu

VMEM_LIMIT = 64 * 1024 * 1024


def _round_up(x, m):
    return ((x + m - 1) // m) * m


def _pick_tile(n, cands=(512, 256, 128)):
    for t in cands:
        if n % t == 0:
            return t
    return n


# ----------------------------------------------------------------------------
# Kernel 1: tiled, lane-dense conv-as-matmul with fused bias + ReLU.
#   out[b] = relu(W @ x[b] + bias), W:(M,K) (M = Cout, small), x:(B,K,N),
#   N = OH*OW on the lane axis (padded to a multiple of 128 -> unmasked vst).
#   grid = (B, N-tiles, K-tiles); f32 VMEM accumulator; bf16 MXU operands.
# ----------------------------------------------------------------------------
def _conv_mm_kernel(w_ref, x_ref, b_ref, o_ref, acc_ref, *, relu):
    @pl.when(pl.program_id(2) == 0)
    def _():
        acc_ref[...] = jnp.zeros_like(acc_ref)

    acc_ref[...] += jnp.dot(w_ref[...], x_ref[0],
                            preferred_element_type=jnp.float32)

    @pl.when(pl.program_id(2) == pl.num_programs(2) - 1)
    def _():
        r = acc_ref[...] + b_ref[...]
        if relu:
            r = jnp.maximum(r, 0.0)
        o_ref[0] = r


def _matmul_bias_act(w, x, bias=None, relu=False):
    """w: (M, K), x: (B, K, N)  ->  (B, M, N) = relu(w @ x[b] + bias)."""
    M, K = w.shape
    B, _, N = x.shape
    Mp = _round_up(M, 8)
    Np = _round_up(N, 128)
    if K > 512:
        Kp = _round_up(K, 128)
        tk = _pick_tile(Kp)
    else:
        Kp, tk = K, K                      # single full-dim K tile
    tn = _pick_tile(Np)

    w_p = jnp.pad(w.astype(jnp.bfloat16), ((0, Mp - M), (0, Kp - K)))
    x_p = jnp.pad(x.astype(jnp.bfloat16), ((0, 0), (0, Kp - K), (0, Np - N)))
    if bias is None:
        b_p = jnp.zeros((Mp, 1), jnp.float32)
    else:
        b_p = jnp.pad(jnp.reshape(bias, (M, 1)).astype(jnp.float32),
                      ((0, Mp - M), (0, 0)))

    out = pl.pallas_call(
        functools.partial(_conv_mm_kernel, relu=relu),
        grid=(B, Np // tn, Kp // tk),
        in_specs=[pl.BlockSpec((Mp, tk), lambda b, n, k: (0, k)),
                  pl.BlockSpec((1, tk, tn), lambda b, n, k: (b, k, n)),
                  pl.BlockSpec((Mp, 1), lambda b, n, k: (0, 0))],
        out_specs=pl.BlockSpec((1, Mp, tn), lambda b, n, k: (b, 0, n)),
        out_shape=jax.ShapeDtypeStruct((B, Mp, Np), jnp.float32),
        scratch_shapes=[pltpu.VMEM((Mp, tn), jnp.float32)],
        compiler_params=pltpu.CompilerParams(
            dimension_semantics=("parallel", "parallel", "arbitrary"),
            vmem_limit_bytes=VMEM_LIMIT),
    )(w_p, x_p, b_p)
    return out[:, :M, :N]


def conv1x1(x, w, bias=None, relu=False):
    """1x1 conv: pure matmul, no im2col, lane-dense output."""
    B, Cin, H, W = x.shape
    Cout = w.shape[0]
    out = _matmul_bias_act(w.reshape(Cout, -1), x.reshape(B, Cin, H * W),
                           bias=bias, relu=relu)
    return out.reshape(B, Cout, H, W)


def conv3x3_head(x, w, bias=None, relu=False):
    """3x3 / s1 / p1 decode-head conv (tiny spatial: pyramid bins / guide map)
    via tap stacking + the tiled matmul kernel.
    # TODO(synk): move the halo'd tap extraction into the kernel for large maps.
    """
    B, Cin, H, W = x.shape
    Cout, _, kh, kw = w.shape
    xp = jnp.pad(x, ((0, 0), (0, 0), (1, 1), (1, 1)))
    taps = [xp[:, :, i:i + H, j:j + W] for i in range(kh) for j in range(kw)]
    col = jnp.stack(taps, axis=2).reshape(B, Cin * kh * kw, H * W)
    out = _matmul_bias_act(w.reshape(Cout, Cin * kh * kw), col,
                           bias=bias, relu=relu)
    return out.reshape(B, Cout, H, W)


def backbone_conv(x, w, stride=1, padding=0, dilation=1, relu=True):
    # TODO(synk): the pretrained frozen ResNet-50/101/152 backbone (+ BN stats)
    # is a small surrogate conv stack here; it runs through XLA's native
    # dilated conv (no 9x im2col HBM amplification) — the ASGNet head is Pallas.
    out = lax.conv_general_dilated(
        x, w, window_strides=(stride, stride),
        padding=[(padding, padding), (padding, padding)],
        rhs_dilation=(dilation, dilation),
        dimension_numbers=('NCHW', 'OIHW', 'NCHW'))
    return jnp.maximum(out, 0.0) if relu else out


# ----------------------------------------------------------------------------
# Plain-JAX glue: maxpool, bilinear resize (align_corners=True), adaptive pool
# ----------------------------------------------------------------------------
def max_pool_3x3_s2(x):
    return lax.reduce_window(x, -jnp.inf, lax.max,
                             (1, 1, 3, 3), (1, 1, 2, 2),
                             [(0, 0), (0, 0), (1, 1), (1, 1)])


def bilinear_resize(x, out_h, out_w):
    B, C, H, W = x.shape

    def coords(o, i):
        if o == 1:
            return jnp.zeros((o,), jnp.float32)
        return jnp.arange(o, dtype=jnp.float32) * (i - 1) / (o - 1)

    ys, xs = coords(out_h, H), coords(out_w, W)
    y0 = jnp.floor(ys).astype(jnp.int32)
    y1 = jnp.minimum(y0 + 1, H - 1)
    x0 = jnp.floor(xs).astype(jnp.int32)
    x1 = jnp.minimum(x0 + 1, W - 1)
    wy = (ys - y0.astype(jnp.float32))[None, None, :, None]
    wx = (xs - x0.astype(jnp.float32))[None, None, None, :]
    g = lambda yi, xi: x[:, :, yi, :][:, :, :, xi]
    return (g(y0, x0) * (1 - wy) * (1 - wx) + g(y0, x1) * (1 - wy) * wx
            + g(y1, x0) * wy * (1 - wx) + g(y1, x1) * wy * wx)


def adaptive_avg_pool(x, out):
    B, C, H, W = x.shape
    rows = []
    for i in range(out):
        hs, he = (i * H) // out, ((i + 1) * H + out - 1) // out
        cols = []
        for j in range(out):
            ws, we = (j * W) // out, ((j + 1) * W + out - 1) // out
            cols.append(jnp.mean(x[:, :, hs:he, ws:we], axis=(2, 3)))
        rows.append(jnp.stack(cols, axis=-1))
    return jnp.stack(rows, axis=-2)


# ----------------------------------------------------------------------------
# Kernel 2: Weighted_GAP  (masked global average pooling)
# ----------------------------------------------------------------------------
def _wgap_kernel(ft_ref, m_ref, o_ref):
    ft = ft_ref[0]                                              # (L, C)
    m = m_ref[0]                                                # (1, L)
    num = jnp.dot(m, ft, preferred_element_type=jnp.float32)    # (1, C)
    area = jnp.sum(m, axis=1, keepdims=True) + 0.0005
    o_ref[0] = num * pl.reciprocal(area, approx=True)


def weighted_gap(supp_feat, mask):
    B, C, H, W = supp_feat.shape
    L = H * W
    ft = supp_feat.reshape(B, C, L).transpose(0, 2, 1).astype(jnp.float32)
    m = mask.reshape(B, 1, L).astype(jnp.float32)
    out = pl.pallas_call(
        _wgap_kernel,
        grid=(B,),
        in_specs=[pl.BlockSpec((1, L, C), lambda b: (b, 0, 0)),
                  pl.BlockSpec((1, 1, L), lambda b: (b, 0, 0))],
        out_specs=pl.BlockSpec((1, 1, C), lambda b: (b, 0, 0)),
        out_shape=jax.ShapeDtypeStruct((B, 1, C), jnp.float32),
        compiler_params=pltpu.CompilerParams(
            dimension_semantics=("parallel",), vmem_limit_bytes=VMEM_LIMIT),
    )(ft, m)
    return out.reshape(B, C, 1, 1)


# ----------------------------------------------------------------------------
# Kernel 3: correlation prior mask (cosine sim, max over support pixels).
#   Query axis tiled (lane tiles), per-pixel norms folded in via pl.reciprocal,
#   bf16 MXU operands.  Min-max normalisation is a trivial O(L) op done outside.
# ----------------------------------------------------------------------------
def _prior_kernel(st_ref, q_ref, o_ref):
    st = st_ref[0]                                              # (Ls, C)
    q = q_ref[0]                                                # (C, tq)
    sn = jnp.sqrt(jnp.sum(st * st, axis=1, keepdims=True))      # (Ls, 1)
    qn = jnp.sqrt(jnp.sum(q * q, axis=0, keepdims=True))        # (1, tq)
    st_n = st * pl.reciprocal(jnp.maximum(sn, 1e-6), approx=True)
    q_n = q * pl.reciprocal(jnp.maximum(qn, 1e-6), approx=True)
    sim = jnp.dot(st_n.astype(jnp.bfloat16), q_n.astype(jnp.bfloat16),
                  preferred_element_type=jnp.float32)           # (Ls, tq)
    o_ref[0] = jnp.max(sim, axis=0, keepdims=True)              # (1, tq)


def prior_mask(query_feat4, supp_feat4_masked):
    B, C, Hq, Wq = query_feat4.shape
    Hs, Ws = supp_feat4_masked.shape[2], supp_feat4_masked.shape[3]
    Lq, Ls = Hq * Wq, Hs * Ws
    Lqp = _round_up(Lq, 128)
    tq = _pick_tile(Lqp)
    q = jnp.pad(query_feat4.reshape(B, C, Lq).astype(jnp.float32),
                ((0, 0), (0, 0), (0, Lqp - Lq)))
    st = supp_feat4_masked.reshape(B, C, Ls).transpose(0, 2, 1).astype(jnp.float32)
    smax = pl.pallas_call(
        _prior_kernel,
        grid=(B, Lqp // tq),
        in_specs=[pl.BlockSpec((1, Ls, C), lambda b, j: (b, 0, 0)),
                  pl.BlockSpec((1, C, tq), lambda b, j: (b, 0, j))],
        out_specs=pl.BlockSpec((1, 1, tq), lambda b, j: (b, 0, j)),
        out_shape=jax.ShapeDtypeStruct((B, 1, Lqp), jnp.float32),
        compiler_params=pltpu.CompilerParams(
            dimension_semantics=("parallel", "parallel"),
            vmem_limit_bytes=VMEM_LIMIT),
    )(st, q)
    smax = smax[:, 0, :Lq]
    mn = jnp.min(smax, axis=1, keepdims=True)
    mx = jnp.max(smax, axis=1, keepdims=True)
    corr = (smax - mn) / (mx - mn + 1e-7)
    return corr.reshape(B, 1, Hq, Wq)


# ----------------------------------------------------------------------------
# Kernel 4: superpixel-center EM iterations (sp_center_iter), batched over
# (batch, shot) on a parallel grid axis.  Spatial coords are pre-scaled by 0.1
# so the (spat_dist / 100) term of the reference folds into one distance dot.
# Single feature copy; transposed contraction via lax.dot_general; unrolled.
# ----------------------------------------------------------------------------
def _sp_center_kernel(ft_ref, m_ref, c0_ref, o_ref, *, n_iter):
    ft = ft_ref[0]                                       # (L, C+2)
    m = m_ref[0]                                         # (L, 1)  ROI indicator
    ft_sq = jnp.sum(ft * ft, axis=1, keepdims=True)      # (L, 1)
    ft_b = ft.astype(jnp.bfloat16)
    c = c0_ref[0]                                        # (C+2, S)
    for _ in range(n_iter):                              # static unroll
        c_sq = jnp.sum(c * c, axis=0, keepdims=True)     # (1, S)
        cross = jnp.dot(ft_b, c.astype(jnp.bfloat16),
                        preferred_element_type=jnp.float32)        # (L, S)
        total = jnp.sqrt(jnp.maximum(ft_sq + c_sq - 2.0 * cross, 0.0))
        assoc = jnp.exp(-total) * m                      # non-ROI pixels -> 0
        colsum = jnp.sum(assoc, axis=0, keepdims=True)   # (1, S)
        assoc = assoc * pl.reciprocal(colsum + 1e-8, approx=True)
        c = lax.dot_general(ft_b, assoc.astype(jnp.bfloat16),
                            (((0,), (0,)), ((), ())),
                            preferred_element_type=jnp.float32)    # (C+2, S)
    o_ref[0] = c


def sp_center_iter_batched(ft_aug, roi_mask, init_centers, n_iter):
    """ft_aug (G, L, C+2); roi_mask (G, L, 1); init_centers (G, C+2, S)."""
    G, L, Ca = ft_aug.shape
    S = init_centers.shape[-1]
    out = pl.pallas_call(
        functools.partial(_sp_center_kernel, n_iter=n_iter),
        grid=(G,),
        in_specs=[pl.BlockSpec((1, L, Ca), lambda g: (g, 0, 0)),
                  pl.BlockSpec((1, L, 1), lambda g: (g, 0, 0)),
                  pl.BlockSpec((1, Ca, S), lambda g: (g, 0, 0))],
        out_specs=pl.BlockSpec((1, Ca, S), lambda g: (g, 0, 0)),
        out_shape=jax.ShapeDtypeStruct((G, Ca, S), jnp.float32),
        compiler_params=pltpu.CompilerParams(
            dimension_semantics=("parallel",), vmem_limit_bytes=VMEM_LIMIT),
    )(ft_aug.astype(jnp.float32), roi_mask.astype(jnp.float32),
      init_centers.astype(jnp.float32))
    return out[:, :Ca - 2, :]                            # drop the xy rows


# ----------------------------------------------------------------------------
# Kernel 5: guide features (cosine-sim map, prob map, argmax gather), batched.
# ----------------------------------------------------------------------------
def _guide_kernel(c_ref, q_ref, p_ref, g_ref):
    c = c_ref[0]                                         # (C, S)
    q = q_ref[0]                                         # (C, L)
    eps = 1e-7
    cn = jnp.sqrt(jnp.sum(c * c, axis=0, keepdims=True))          # (1, S)
    qn = jnp.sqrt(jnp.sum(q * q, axis=0, keepdims=True))          # (1, L)
    c_n = c * pl.reciprocal(jnp.maximum(cn, eps), approx=True)
    q_n = q * pl.reciprocal(jnp.maximum(qn, eps), approx=True)
    cos = lax.dot_general(c_n.astype(jnp.bfloat16), q_n.astype(jnp.bfloat16),
                          (((0,), (0,)), ((), ())),
                          preferred_element_type=jnp.float32)     # (S, L)
    p_ref[0] = jnp.sum(cos, axis=0, keepdims=True)                # prob map
    best = jnp.max(cos, axis=0, keepdims=True)
    sidx = lax.broadcasted_iota(jnp.int32, cos.shape, 0)
    pick = jnp.where(cos >= best, sidx, cos.shape[0])
    amax = jnp.min(pick, axis=0, keepdims=True)                   # first argmax
    onehot = (sidx == amax).astype(jnp.float32)                   # (S, L)
    g_ref[0] = jnp.dot(c, onehot, preferred_element_type=jnp.float32)  # exact gather


def guide_features_batched(sp_center, query_flat):
    Bg, C, S = sp_center.shape
    L = query_flat.shape[-1]
    prob, guide = pl.pallas_call(
        _guide_kernel,
        grid=(Bg,),
        in_specs=[pl.BlockSpec((1, C, S), lambda b: (b, 0, 0)),
                  pl.BlockSpec((1, C, L), lambda b: (b, 0, 0))],
        out_specs=(pl.BlockSpec((1, 1, L), lambda b: (b, 0, 0)),
                   pl.BlockSpec((1, C, L), lambda b: (b, 0, 0))),
        out_shape=(jax.ShapeDtypeStruct((Bg, 1, L), jnp.float32),
                   jax.ShapeDtypeStruct((Bg, C, L), jnp.float32)),
        compiler_params=pltpu.CompilerParams(
            dimension_semantics=("parallel",), vmem_limit_bytes=VMEM_LIMIT),
    )(sp_center.astype(jnp.float32), query_flat.astype(jnp.float32))
    return prob, guide


# ----------------------------------------------------------------------------
# Surrogate backbone params + head params
# ----------------------------------------------------------------------------
def init_params(key, cfg):
    keys = list(jax.random.split(key, 64))
    ks = iter(keys)

    def conv_w(cout, cin, k):
        fan = cin * k * k
        return jax.random.normal(next(ks), (cout, cin, k, k), jnp.float32) / np.sqrt(fan)

    rd, cls = cfg['reduce_dim'], cfg['classes']
    fea = cfg['c3'] + cfg['c2']
    nb = len(cfg['pyramid_bins'])
    p = {}
    p['l0'] = conv_w(cfg['c0'], 3, 3)
    p['l1'] = conv_w(cfg['c1'], cfg['c0'], 3)
    p['l2'] = conv_w(cfg['c2'], cfg['c1'], 3)
    p['l3'] = conv_w(cfg['c3'], cfg['c2'], 3)
    p['l4'] = conv_w(cfg['c4'], cfg['c3'], 3)
    p['down_conv'] = conv_w(rd, fea, 1)
    p['corr_conv'] = [conv_w(rd, rd * 2 + 2, 1) for _ in range(nb)]
    p['beta_conv'] = [(conv_w(rd, rd, 3), conv_w(rd, rd, 3)) for _ in range(nb)]
    p['inner_cls'] = [(conv_w(rd, rd, 3), conv_w(cls, rd, 1),
                       jax.random.normal(next(ks), (cls,), jnp.float32) * 0.01)
                      for _ in range(nb)]
    p['alpha_conv'] = [conv_w(rd, 2 * rd, 1) for _ in range(nb - 1)]
    p['res1'] = conv_w(rd, rd * nb, 1)
    p['res2'] = (conv_w(rd, rd, 3), conv_w(rd, rd, 3))
    p['cls'] = (conv_w(rd, rd, 3), conv_w(cls, rd, 1),
                jax.random.normal(next(ks), (cls,), jnp.float32) * 0.01)
    return p


# ----------------------------------------------------------------------------
# Full forward pass (eval mode, pyramid branch, zoom_factor == 1)
# ----------------------------------------------------------------------------
def forward(params, x, s_x, s_y, s_seed, *, shot, eval_iter, pyramid_bins,
            num_sp_static):
    B = x.shape[0]
    assert (x.shape[2] - 1) % 8 == 0 and (x.shape[3] - 1) % 8 == 0

    def backbone_to3(img):
        f0 = max_pool_3x3_s2(backbone_conv(img, params['l0'], stride=2, padding=1))
        f1 = backbone_conv(f0, params['l1'], stride=1, padding=1)
        f2 = backbone_conv(f1, params['l2'], stride=2, padding=1)
        f3 = backbone_conv(f2, params['l3'], stride=1, padding=2, dilation=2)
        return f2, f3

    def layer4(f):
        return backbone_conv(f, params['l4'], stride=1, padding=4, dilation=4)

    # ---- query branch ----
    qf2, qf3 = backbone_to3(x)
    qf4 = layer4(qf3)
    query_feat = conv1x1(jnp.concatenate([qf3, qf2], 1), params['down_conv'])  # Dropout2d(0.5)=id

    # ---- support branch ----
    supp_feat_list, final_supp_list, mask_list = [], [], []
    for i in range(shot):
        mask = (s_y[:, i] == 1.0).astype(jnp.float32)[:, None]
        sf2, sf3 = backbone_to3(s_x[:, i])
        mask = bilinear_resize(mask, sf3.shape[2], sf3.shape[3])
        sf4 = layer4(sf3 * mask)
        final_supp_list.append(sf4)
        mask_list.append(mask)
        supp_feat_list.append(conv1x1(jnp.concatenate([sf3, sf2], 1), params['down_conv']))

    # ---- correlation prior mask ----
    corr_list = []
    for i, sf4 in enumerate(final_supp_list):
        tmp_mask = bilinear_resize(mask_list[i], sf4.shape[2], sf4.shape[3])
        corr = prior_mask(qf4, sf4 * tmp_mask)
        corr_list.append(bilinear_resize(corr, qf3.shape[2], qf3.shape[3]))
    corr_query_mask = jnp.mean(jnp.concatenate(corr_list, 1), axis=1, keepdims=True)
    corr_query_mask = bilinear_resize(corr_query_mask, query_feat.shape[2],
                                      query_feat.shape[3])

    # ---- superpixel centers: per-(batch, shot) loops folded into a parallel
    #      Pallas grid, grouped by num_sp (data-dependent, resolved host-side) --
    rd = query_feat.shape[1]
    H3, W3 = query_feat.shape[2], query_feat.shape[3]
    L3 = H3 * W3
    Hs, Ws = supp_feat_list[0].shape[2], supp_feat_list[0].shape[3]
    Ls = Hs * Ws
    hh = jnp.broadcast_to(jnp.arange(Hs, dtype=jnp.float32)[:, None], (Hs, Ws))
    ww = jnp.broadcast_to(jnp.arange(Ws, dtype=jnp.float32)[None, :], (Hs, Ws))
    xy = jnp.stack([hh.reshape(Ls), ww.reshape(Ls)], axis=1) * 0.1

    sp_center_per, em_groups = {}, {}
    for b in range(B):
        for s in range(shot):
            nsp = int(num_sp_static[b][s])
            if nsp <= 1:
                proto = weighted_gap(supp_feat_list[s][b:b + 1], mask_list[s][b:b + 1])
                sp_center_per[(b, s)] = proto[0, :, :, 0]            # (C, 1)
            else:
                em_groups.setdefault(nsp, []).append((b, s))

    for nsp, entries in em_groups.items():
        fts, rois, c0s = [], [], []
        for (b, s) in entries:
            sf = supp_feat_list[s][b]                                # (C, Hs, Ws)
            sm = mask_list[s][b]                                     # (1, Hs, Ws)
            seeds = s_seed[b, s, :nsp]                               # (nsp, 2)
            ft = jnp.concatenate([sf.reshape(rd, Ls).T, xy], axis=1)  # (Ls, C+2)
            roi = (sm == 1.0).astype(jnp.float32).reshape(Ls, 1)
            c0 = sf[:, seeds[:, 0], seeds[:, 1]]                     # (C, nsp)
            c0 = jnp.concatenate([c0, seeds.T.astype(jnp.float32) * 0.1], axis=0)
            fts.append(ft)
            rois.append(roi)
            c0s.append(c0)
        centers = sp_center_iter_batched(jnp.stack(fts), jnp.stack(rois),
                                         jnp.stack(c0s), eval_iter)   # (G, C, nsp)
        for gi, (b, s) in enumerate(entries):
            sp_center_per[(b, s)] = centers[gi]

    sp_center_b = [jnp.concatenate([sp_center_per[(b, s)] for s in range(shot)],
                                   axis=1) for b in range(B)]

    # ---- guide features & prob map (batched over B; the shot==1 single-
    #      prototype special case reduces to the same math) ----
    qflat = query_feat.reshape(B, rd, L3)
    prob_rows, guide_rows, gf_groups = [None] * B, [None] * B, {}
    for b in range(B):
        gf_groups.setdefault(int(sp_center_b[b].shape[1]), []).append(b)
    for _, bs in gf_groups.items():
        sc = jnp.stack([sp_center_b[b] for b in bs])
        qf = jnp.stack([qflat[b] for b in bs])
        prob_g, guide_g = guide_features_batched(sc, qf)
        for gi, b in enumerate(bs):
            prob_rows[b] = prob_g[gi]
            guide_rows[b] = guide_g[gi]
    prob_map = jnp.stack(prob_rows).reshape(B, 1, H3, W3)
    guide_feat = jnp.concatenate(
        [query_feat, jnp.stack(guide_rows).reshape(B, rd, H3, W3)], axis=1)

    # ---- pyramid decoding head ----
    out_list, pyramid_feat_list = [], []
    for idx, tmp_bin in enumerate(pyramid_bins):
        bin_ = int(guide_feat.shape[2] * tmp_bin) if tmp_bin <= 1.0 else int(tmp_bin)
        guide_feat_bin = adaptive_avg_pool(guide_feat, bin_)
        prob_map_bin = bilinear_resize(prob_map, bin_, bin_)
        corr_mask_bin = bilinear_resize(corr_query_mask, bin_, bin_)
        merge = jnp.concatenate([guide_feat_bin, prob_map_bin, corr_mask_bin], 1)
        merge = conv1x1(merge, params['corr_conv'][idx], relu=True)
        if idx >= 1:
            pre = bilinear_resize(pyramid_feat_list[idx - 1], bin_, bin_)
            rec = jnp.concatenate([merge, pre], 1)
            merge = conv1x1(rec, params['alpha_conv'][idx - 1], relu=True) + merge
        w1, w2 = params['beta_conv'][idx]
        merge = conv3x3_head(conv3x3_head(merge, w1, relu=True), w2, relu=True) + merge
        wi1, wi2, bi = params['inner_cls'][idx]
        inner = conv1x1(conv3x3_head(merge, wi1, relu=True), wi2, bias=bi)  # Dropout2d(0.1)=id
        merge = bilinear_resize(merge, guide_feat.shape[2], guide_feat.shape[3])
        pyramid_feat_list.append(merge)
        out_list.append(inner)

    final_feat = conv1x1(jnp.concatenate(pyramid_feat_list, 1), params['res1'], relu=True)
    r1, r2 = params['res2']
    final_feat = conv3x3_head(conv3x3_head(final_feat, r1, relu=True),
                              r2, relu=True) + final_feat
    wc1, wc2, bc = params['cls']
    out = conv1x1(conv3x3_head(final_feat, wc1, relu=True), wc2, bias=bc)
    # zoom_factor == 1 -> no final bilinear upsample; eval mode -> return logits
    return out


# ----------------------------------------------------------------------------
if __name__ == "__main__":
    cfg = dict(c0=8, c1=8, c2=12, c3=20, c4=16, reduce_dim=16, classes=2,
               pyramid_bins=[4, 2], shot=1, eval_iter=3)
    key = jax.random.PRNGKey(0)
    kp, kx, ks = jax.random.split(key, 3)
    params = init_params(kp, cfg)

    B, shot, H, W = 2, cfg['shot'], 33, 33                 # (33-1) % 8 == 0
    x = jax.random.normal(kx, (B, 3, H, W), jnp.float32)
    s_x = jax.random.normal(ks, (B, shot, 3, H, W), jnp.float32)
    s_y = jnp.ones((B, shot, H, W), jnp.float32)           # full-foreground support mask
    seeds_np = np.tile(np.array([[[1, 1], [1, 3], [3, 1], [3, 3]]],
                                dtype=np.int32)[None], (B, shot, 1, 1))   # (B,shot,4,2)
    s_seed = jnp.asarray(seeds_np)

    # TODO(synk): num_sp comes from torch.nonzero on concrete seed data
    # (data-dependent control flow) -> resolved host-side, as in the torch eval loop.
    num_sp_static = [[int(max(np.count_nonzero(seeds_np[b, s, :, 0]),
                              np.count_nonzero(seeds_np[b, s, :, 1])))
                      for s in range(shot)] for b in range(B)]

    # smoke-test the Weighted_GAP kernel (only reached in-graph when num_sp <= 1)
    _ = jax.block_until_ready(
        weighted_gap(jax.random.normal(kx, (1, cfg['reduce_dim'], 5, 5), jnp.float32),
                     jnp.ones((1, 1, 5, 5), jnp.float32)))

    out = forward(params, x, s_x, s_y, s_seed,
                  shot=shot, eval_iter=cfg['eval_iter'],
                  pyramid_bins=cfg['pyramid_bins'],
                  num_sp_static=num_sp_static)
    out = jax.block_until_ready(out)
    assert out.shape == (B, cfg['classes'], 5, 5)
    assert bool(jnp.all(jnp.isfinite(out)))
    print("KERNEL_OK")
</pallas_src>

<mosaic_0001>
module attributes {stable_mosaic.version = 11 : i64} {
  func.func @_wgap_kernel(%arg0: i32, %arg1: memref<1x25x16xf32, #tpu.memory_space<vmem>>, %arg2: memref<1x1x25xf32, #tpu.memory_space<vmem>>, %arg3: memref<1x1x16xf32, #tpu.memory_space<vmem>>) attributes {dimension_semantics = [#tpu.dimension_semantics<parallel>], iteration_bounds = array<i64: 1>, scalar_prefetch = 0 : i64, scratch_operands = 0 : i64, tpu.core_type = #tpu.core_type<tc>, window_params = [{transform_indices = @transform_0, window_bounds = array<i64: 1, 25, 16>}, {transform_indices = @transform_1, window_bounds = array<i64: 1, 1, 25>}, {transform_indices = @transform_2, window_bounds = array<i64: 1, 1, 16>}]} {
    %c0 = arith.constant 0 : index
    %c0_0 = arith.constant 0 : index
    %c0_1 = arith.constant 0 : index
    %0 = vector.load %arg1[%c0, %c0_0, %c0_1] : memref<1x25x16xf32, #tpu.memory_space<vmem>>, vector<1x25x16xf32>
    %1 = vector.shape_cast %0 : vector<1x25x16xf32> to vector<25x16xf32>
    %c0_2 = arith.constant 0 : index
    %c0_3 = arith.constant 0 : index
    %c0_4 = arith.constant 0 : index
    %2 = vector.load %arg2[%c0_2, %c0_3, %c0_4] : memref<1x1x25xf32, #tpu.memory_space<vmem>>, vector<1x1x25xf32>
    %3 = vector.shape_cast %2 : vector<1x1x25xf32> to vector<1x25xf32>
    %cst = arith.constant dense<0.000000e+00> : vector<1x16xf32>
    %4 = tpu.matmul %3, %1, %cst {dimension_numbers = #tpu.dot_dimension_numbers<[1], [0], [0], [1], [0, 0, 1, 1], [], []>} : vector<1x25xf32>, vector<25x16xf32>, vector<1x16xf32> -> vector<1x16xf32>
    %cst_5 = arith.constant dense<0.000000e+00> : vector<1xf32>
    %5 = vector.multi_reduction <add>, %3, %cst_5 [1] : vector<1x25xf32> to vector<1xf32>
    %6 = vector.shape_cast %5 : vector<1xf32> to vector<1x1xf32>
    %cst_6 = arith.constant 5.000000e-04 : f32
    %7 = vector.broadcast %cst_6 : f32 to vector<1x1xf32>
    %8 = arith.addf %6, %7 : vector<1x1xf32>
    %9 = tpu.reciprocal %8 {approx = true} : vector<1x1xf32> -> vector<1x1xf32>
    %10 = vector.broadcast %9 : vector<1x1xf32> to vector<1x16xf32>
    %11 = arith.mulf %4, %10 : vector<1x16xf32>
    %c0_7 = arith.constant 0 : index
    %c0_8 = arith.constant 0 : index
    %c0_9 = arith.constant 0 : index
    %12 = vector.load %arg3[%c0_7, %c0_8, %c0_9] : memref<1x1x16xf32, #tpu.memory_space<vmem>>, vector<1x1x16xf32>
    %13 = vector.shape_cast %12 : vector<1x1x16xf32> to vector<1x16xf32>
    %14 = vector.shape_cast %11 : vector<1x16xf32> to vector<1x1x16xf32>
    tpu.vector_store %arg3[%c0_7, %c0_8, %c0_9], %14 {strides = array<i32>} : memref<1x1x16xf32, #tpu.memory_space<vmem>>, vector<1x1x16xf32>,
    return
  }
  func.func @transform_0(%arg0: i32) -> (i32, i32, i32) {
    %c0_i32 = arith.constant 0 : i32
    %c0_i32_0 = arith.constant 0 : i32
    %c0_i32_1 = arith.constant 0 : i32
    return %arg0, %c0_i32, %c0_i32_0 : i32, i32, i32
  }
  func.func @transform_1(%arg0: i32) -> (i32, i32, i32) {
    %c0_i32 = arith.constant 0 : i32
    %c0_i32_0 = arith.constant 0 : i32
    %c0_i32_1 = arith.constant 0 : i32
    return %arg0, %c0_i32, %c0_i32_0 : i32, i32, i32
  }
  func.func @transform_2(%arg0: i32) -> (i32, i32, i32) {
    %c0_i32 = arith.constant 0 : i32
    %c0_i32_0 = arith.constant 0 : i32
    %c0_i32_1 = arith.constant 0 : i32
    return %arg0, %c0_i32, %c0_i32_0 : i32, i32, i32
  }
}

</mosaic_0001>

<bundles_post_ra>
// kernel: tpu_custom_call.1
= control target key start
LH: loop header
LB: loop body
LE: loop exit
PB: predicated region body
PF: predicated region fallthrough
CT: control target
= control target key end

     0   :  { %7 = vsyncpa [#allocation3], 0  ;;  %s314_s0 = inlined_call_operand.hbm [shape: f32[1,25,16], index: 0, kind: input, shape index: {}]   ;;  %s315_s1 = inlined_call_operand.hbm [shape: f32[1,1,25], index: 1, kind: input, shape index: {}]   ;;  %s316_s2 = inlined_call_operand.hbm [shape: f32[1,1,16], index: 2, kind: output, shape index: {}]  }
   0x1   :  { %8 = vsyncpa [#allocation6], 0 }
   0x2   :  { %9 = vsyncpa [#allocation4], 0  ;;  %s254_s9 = smov [#allocation2]   ;;  %s182_s13 = scalar_lea.hbm %s314_s0, 512 }
   0x3   :  { %s15_s10 = sshll.u32 %s254_s9, 4  ;;  %p183_p0 = scmp.ne.s32.totalorder %s314_s0, %s182_s13  ;;  %s16_s10 = int_to_ptr.vmem [resolvable:$true] %s15_s10 }
   0x4   :  { %p186_p1 = scmp.lt.u32.totalorder %s182_s13, %s314_s0 }
   0x6   :  { %p188_p2 = pnand %p186_p1, %p183_p0 }
   0x8   :  { %191 = shalt.err (!%p188_p2)
}
   0x9   :  { %s192_s18 = scalar_lea.vmem %s16_s10, 512  ;;  %p197_p4 = scmp.lt.s32.totalorder %s16_s10, %s16_s10 }
   0xa   :  { %p193_p3 = scmp.ne.s32.totalorder %s16_s10, %s192_s18  ;;  %p198_p5 = scmp.lt.s32.totalorder %s192_s18, %s192_s18 }
   0xc   :  { %p199_p6 = por %p198_p5, %p197_p4 }
   0xe   :  { %p200_p7 = pnand %p199_p6, %p193_p3 }
  0x10   :  { %203 = shalt.err (!%p200_p7)
}
  0x11   :  { %s255_s19 = smov 128   ;;  %s256_s20 = smov 8  }
  0x12   :  { %21 = dma.hbm_to_vmem [thread:$0]  %s314_s0, 512, %s16_s10, [#allocation3], %s255_s19, %s255_s19, %s256_s20  }
  0x13   :  { %s257_s23 = smov [#allocation5]   ;;  %s204_s27 = scalar_lea.hbm %s315_s1, 16 }
  0x14   :  { %s28_s24 = sshll.u32 %s257_s23, 4  ;;  %p205_p8 = scmp.ne.s32.totalorder %s315_s1, %s204_s27  ;;  %s29_s24 = int_to_ptr.vmem [resolvable:$true] %s28_s24 }
  0x15   :  { %p208_p9 = scmp.lt.u32.totalorder %s204_s27, %s315_s1 }
  0x17   :  { %p210_p10 = pnand %p208_p9, %p205_p8 }
  0x19   :  { %213 = shalt.err (!%p210_p10)
}
  0x1a   :  { %s214_s4 = scalar_lea.vmem %s29_s24, 16  ;;  %s218_s0 = scalar_lea.vmem %s29_s24, 32 }
  0x1b   :  { %p215_p11 = scmp.ne.s32.totalorder %s29_s24, %s214_s4  ;;  %p219_p12 = scmp.lt.s32.totalorder %s29_s24, %s29_s24 }
  0x1c   :  { %p220_p13 = scmp.lt.s32.totalorder %s218_s0, %s214_s4 }
  0x1e   :  { %p221_p0 = por %p220_p13, %p219_p12 }
  0x20   :  { %p222_p1 = pnand %p221_p0, %p215_p11 }
  0x22   :  { %225 = shalt.err (!%p222_p1)
}
  0x23   :  { %31 = dma.hbm_to_vmem [thread:$0]  %s315_s1, 16, %s29_s24, [#allocation6]  }
  0x24   :  { %248 = dma.done.wait [#allocation3], 512  }
  0x25   :  { %249 = vsyncadd [#allocation3], 4294966784 }
  0x26   :  { %250 = dma.done.wait [#allocation6], 16  }
  0x27   :  { %251 = vsyncadd [#allocation6], 4294967280  ;;  %v258_v0 = vmov 0.0|0.0   ;;  %vm259_vm0 = vmmov 0   ;;  %v260_v1 = vmov 0.0   ;;  %vm121_vm1 = vcmask 196608  }
  0x28   :  { %164 = vmatprep.subr.bf16.mxu0 %v258_v0  ;;  %161 = vmatprep.mubr.msk.f32.mxu0 %vm259_vm0, %v260_v1  ;;  %v38_v2 = vld [vmem:[#allocation2] sm:$0xff]  ;;  %v39_v3 = vld [vmem:[#allocation2 + $0x8] sm:$0xff]  ;;  %v40_v4 = vld [vmem:[#allocation2 + $0x10] sm:$0xff]  ;;  %vm47_vm2 = vcmask 1040384   ;;  %vm261_vm3 = vmmov 1   ;;  %vm43_vm5 = vcmask 203776  }
  0x29   :  { %v165_v5 = vpack.c.bf16 %v39_v3, %v38_v2  ;;  %v41_v6 = vld [vmem:[#allocation2 + $0x18] sm:$0x1]  ;;  %v42_v7 = vld [vmem:[#allocation5] sm:$0x1]  ;;  %vm169_vm4 = vmpackc.low %vm47_vm2, %vm261_vm3  ;;  %s262_s1 = smov [#allocation7]   ;;  %vm128_vm6 = vcmask 122880  }
  0x2a   :  { %v122_v8 = vsel %vm121_vm1, %v42_v7, 0.0  ;;  %v168_v9 = vpack.c.bf16 %v41_v6, %v40_v4  ;;  %s136_s7 = sshll.u32 %s262_s1, 4  ;;  %s137_s7 = int_to_ptr.vmem [resolvable:$true] %s136_s7 }
  0x2b   :  { %166 = vmatpush3.bf16.msra.mxu0 %v165_v5  ;;  %123 = vadd.xlane.f32.xlu0 %v122_v8  ;;  %s226_s8 = scalar_lea.vmem %s137_s7, 16  ;;  %s230_s9 = scalar_lea.vmem %s137_s7, 32 }
  0x2c   :  { %167 = vmatprep.subr.bf16.mxu0 %v258_v0  ;;  %p227_p2 = scmp.ne.s32.totalorder %s137_s7, %s226_s8  ;;  %p231_p3 = scmp.lt.s32.totalorder %s137_s7, %s137_s7 }
  0x2d   :  { %p232_p4 = scmp.lt.s32.totalorder %s230_s9, %s226_s8 }
  0x2f   :  { %170 = vmatpush3.bf16.msk.msra.mxu0 %vm169_vm4, %v168_v9  ;;  %p233_p5 = por %p232_p4, %p231_p3 }
  0x31   :  { %p234_p6 = pnand %p233_p5, %p227_p2 }
  0x32   :  { %162 = vmatmul.mubr.msk.f32.vlgmr.msra.gmra.mrb[0].mxu0 %vm43_vm5, %v42_v7 }
  0xb8   :  { %v124_v10 = vpop.xlane.xlu0 %123 }
  0xb9   :  { %v125_v11 = vadd.f32 0.0005, %v124_v10 }
  0xbb   :  { %180 = vrcp.f32 %v125_v11 }
  0xc5   :  { %v181_v12 = vpop.eup %180 }
 0x105   :  { %v117_v13 = vpop.f32.mrb[0].mxu0 }
 0x106   :  { %v127_v14 = vmul.f32 %v181_v12, %v117_v13  ;;  %v163_v15 = vpop.f32.mrb[1].mxu0 }
 0x108   :  { %129 = vst.msk [vmem:[#allocation7] sm:$0x1] %vm128_vm6, %v127_v14 }
 0x109   :  { %237 = shalt.err (!%p234_p6)
}
 0x10a   :  { %s238_s12 = scalar_lea.hbm %s316_s2, 16 }
 0x10b   :  { %p239_p7 = scmp.ne.s32.totalorder %s316_s2, %s238_s12  ;;  %p242_p8 = scmp.lt.u32.totalorder %s238_s12, %s316_s2 }
 0x10d   :  { %p244_p9 = pnand %p242_p8, %p239_p7 }
 0x10f   :  { %247 = shalt.err (!%p244_p9)
}
 0x110   :  { %139 = dma.vmem_to_hbm [thread:$0]  %s137_s7, 16, %s316_s2, [#allocation4]  }
 0x111   :  { %252 = dma.done.wait [#allocation4], 16  }
 0x112   :  { %253 = vsyncadd [#allocation4], 4294967280 }
 0x113   :  { %143 = vsyncpa [#allocation3], 1 }
 0x114   :  { %144 = vsyncpa [#allocation6], 1 }
 0x115   :  { %145 = vsyncpa [#allocation4], 1 }

</bundles_post_ra>
